<compile_context>
chip_gen: v6e
topology: v6e:2x2x1
jax: 0.10.0
libtpu: 0.0.40
codegen_flags: <defaults>
</compile_context>

<pallas_src>
import jax
import jax.numpy as jnp
from jax.experimental import pallas as pl
from jax.experimental.pallas import tpu as pltpu


# --------------------------------------------------------------------------- kernel

def _make_dmgi_kernel(num_rel, tile_k):
    """Kernel closed over the (static) relation count and K-tile size.

    refs = (A_0..A_{R-1} int8 tiles, Yagg_0..Yagg_{R-1} resident, inv_scale tile,
            Yroot tile, out tile, acc scratch)
      A_r       : (TN, TK)     int8   raw adjacency counts (exact small ints)
      Yagg_r    : (Npad, 2H)   bf16   [X @ W_l^r | X_perm @ W_l^r]  (grid-invariant)
      inv_scale : (TN, R*2H)   f32    1/deg_r(i) broadcast over each relation's cols
      Yroot     : (TN, R*2H)   f32    [.. | X @ W_r^r + b_l^r | X_perm @ W_r^r + b_l^r | ..]
      out       : (TN, R*2H)   f32
      acc       : (TN, R*2H)   f32    accumulator scratch (lives across k steps)
    """

    def kernel(*refs):
        a_refs = refs[:num_rel]
        yagg_refs = refs[num_rel:2 * num_rel]
        inv_ref, yroot_ref, o_ref, acc_ref = refs[2 * num_rel:]

        k = pl.program_id(1)

        @pl.when(k == 0)
        def _():
            acc_ref[...] = jnp.zeros_like(acc_ref)

        k_off = pl.multiple_of(k * tile_k, tile_k)
        parts = []
        for r in range(num_rel):
            # int8 0/1/2 counts are exact in bf16; two-step cast (i8->f32->bf16) uses
            # only guaranteed-supported VPU converts.  MXU matmul in bf16, f32 accum.
            a_bf16 = a_refs[r][...].astype(jnp.float32).astype(jnp.bfloat16)
            y = yagg_refs[r][pl.ds(k_off, tile_k), :]
            parts.append(jnp.dot(a_bf16, y, preferred_element_type=jnp.float32))
        acc_ref[...] += parts[0] if num_rel == 1 else jnp.concatenate(parts, axis=-1)

        @pl.when(k == pl.num_programs(1) - 1)
        def _():
            # mean = (B @ Yagg) * 1/deg ; add root term (+ folded bias); relu.
            out = acc_ref[...] * inv_ref[...] + yroot_ref[...]
            # Single full-width (lane-dense when R*2H % 128 == 0) store.
            o_ref[...] = jnp.maximum(out, 0.0).astype(o_ref.dtype)

    return kernel


# ------------------------------------------------------------------ tiling / budgets

def _round_up(v, m):
    return (v + m - 1) // m * m


def _vmem_need(tn, tk, npad, num_rel, two_h, out_w):
    a_strips = num_rel * 2 * tn * tk * 1          # int8 adjacency tiles, double-buffered
    conv_tmp = tn * tk * 6                        # i8->f32->bf16 conversion temporaries
    yagg = num_rel * 2 * npad * two_h * 2         # resident bf16 Yagg (2 bufs, conservative)
    io_tiles = 3 * 2 * tn * out_w * 4             # inv_scale + Yroot + out, double-buffered
    acc = tn * out_w * 4                          # f32 accumulator scratch
    return a_strips + conv_tmp + yagg + io_tiles + acc


def _divisor_candidates(npad, desired):
    cands = sorted(
        {c for c in (desired, 8192, 4096, 2048, 1024, 512, 256, 128)
         if c <= min(desired, npad) and npad % c == 0},
        reverse=True,
    )
    return cands or [npad]


def _pick_tiles(npad, num_rel, two_h, out_w, budget, desired_tn, desired_tk):
    """Largest (TN, TK) divisor tiles of npad that fit the per-generation VMEM budget."""
    for tn in _divisor_candidates(npad, desired_tn):
        for tk in _divisor_candidates(npad, desired_tk):
            if _vmem_need(tn, tk, npad, num_rel, two_h, out_w) <= budget:
                return tn, tk
    return 128, 128


def _tpu_limits():
    """(vmem capacity bytes, TensorCores per chip) with safe fallbacks."""
    try:
        info = pltpu.get_tpu_info()
        cap = int(getattr(info, "vmem_capacity_bytes", 64 * 1024 * 1024))
        cores = int(getattr(info, "num_cores", getattr(info, "core_count", 1)))
        return cap, max(cores, 1)
    except Exception:
        return 64 * 1024 * 1024, 1


# --------------------------------------------------------------------------- wrapper

def dmgi_forward(x, adjs, params, perm, *, desired_tile_n=512, desired_tile_k=4096):
    """DMGI.forward (eval mode): returns (pos_hs, neg_hs), lists per relation.

    One fused pallas_call computes relu(SAGE(x)) and relu(SAGE(x[perm])) for every
    relation; each adjacency element is read from HBM exactly once, as int8.
    """
    n, f = x.shape
    h = params[0][0].shape[1]
    num_rel = len(adjs)
    assert num_rel == len(params)
    two_h = 2 * h
    out_w = num_rel * two_h  # R*2H == 128 lanes for R=2,H=32 -> unmasked stores

    x_perm = x[perm]  # negative-sample row shuffle (glue, deterministic key)

    # Pad node count so both grid axes tile cleanly; padded rows are discarded.
    npad = _round_up(n, 128)
    pad_rows = npad - n

    # ---- Reassociation prologue (plain XLA; O(N*F*H), negligible vs. A stream) ----
    yaggs = []      # per relation: (Npad, 2H) bf16 -> MXU rhs, grid-invariant resident
    yroot_cols = []  # per relation: (Npad, 2H) f32 root term (bias folded in)
    inv_cols = []    # per relation: (Npad, 2H) f32 1/deg broadcast over its columns
    adjs_i8 = []     # per relation: (Npad, Npad) int8 raw edge counts (exact)
    for a, (w_l, w_r, b_l) in zip(adjs, params):
        deg = jnp.maximum(a.sum(axis=1, keepdims=True), 1.0)   # duplicates counted, as PyG
        inv = 1.0 / deg
        ya = jnp.concatenate([x @ w_l, x_perm @ w_l], axis=1).astype(jnp.bfloat16)
        yr = jnp.concatenate([x @ w_r + b_l, x_perm @ w_r + b_l], axis=1)
        if pad_rows:
            ya = jnp.pad(ya, ((0, pad_rows), (0, 0)))
            yr = jnp.pad(yr, ((0, pad_rows), (0, 0)))
            inv = jnp.pad(inv, ((0, pad_rows), (0, 0)), constant_values=1.0)
            a = jnp.pad(a, ((0, pad_rows), (0, pad_rows)))
        yaggs.append(ya)
        yroot_cols.append(yr)
        inv_cols.append(jnp.broadcast_to(inv, (npad, two_h)))
        # TODO(synk): assumes edge multiplicities fit in int8 (<=127); clip/split otherwise.
        adjs_i8.append(a.astype(jnp.int8))
    yroot = jnp.concatenate(yroot_cols, axis=1).astype(jnp.float32)      # (Npad, R*2H)
    inv_scale = jnp.concatenate(inv_cols, axis=1).astype(jnp.float32)    # (Npad, R*2H)

    # ---- Per-generation tile sizing (v7x 64 MiB, v5e/v6e 128 MiB VMEM) ----
    vmem_cap, num_cores = _tpu_limits()
    budget = int(vmem_cap * 0.6)
    tn, tk = _pick_tiles(npad, num_rel, two_h, out_w, budget, desired_tile_n, desired_tile_k)
    # Megacore: only split the node axis further on chips with >1 TensorCore.
    while num_cores > 1 and (npad // tn) < num_cores and tn >= 256:
        tn //= 2
    need = _vmem_need(tn, tk, npad, num_rel, two_h, out_w)
    vmem_limit = int(min(max(int(need * 1.3), 16 * 1024 * 1024), int(vmem_cap * 0.9)))

    grid = (npad // tn, npad // tk)  # (node tiles: parallel, K tiles: arbitrary/reduction)

    in_specs = (
        # Streamed int8 adjacency tiles: the dominant HBM traffic, each element read once.
        [pl.BlockSpec((tn, tk), lambda i, k: (i, k)) for _ in range(num_rel)]
        # Grid-invariant, fully-resident Yagg blocks (fetched once, sliced in-kernel).
        + [pl.BlockSpec((npad, two_h), lambda i, k: (0, 0)) for _ in range(num_rel)]
        + [pl.BlockSpec((tn, out_w), lambda i, k: (i, 0)),   # inv_scale node tile
           pl.BlockSpec((tn, out_w), lambda i, k: (i, 0))]   # Yroot node tile (bias folded)
    )
    out_specs = pl.BlockSpec((tn, out_w), lambda i, k: (i, 0))

    # TODO(synk): the dense N^2 adjacency stream is >98% zeros for real graphs; a
    # block-sparse / CSR gather formulation via scalar prefetch would cut HBM traffic
    # by 10-100x and is the next step beyond this dense kernel.
    out = pl.pallas_call(
        _make_dmgi_kernel(num_rel, tk),
        out_shape=jax.ShapeDtypeStruct((npad, out_w), jnp.float32),
        grid_spec=pltpu.PrefetchScalarGridSpec(
            num_scalar_prefetch=0,
            grid=grid,
            in_specs=in_specs,
            out_specs=out_specs,
            scratch_shapes=[pltpu.VMEM((tn, out_w), jnp.float32)],
        ),
        compiler_params=pltpu.CompilerParams(
            dimension_semantics=("parallel", "arbitrary"),
            vmem_limit_bytes=vmem_limit,
        ),
    )(*adjs_i8, *yaggs, inv_scale, yroot)

    out = out[:n]
    pos_hs = [out[:, r * two_h: r * two_h + h] for r in range(num_rel)]
    neg_hs = [out[:, r * two_h + h: (r + 1) * two_h] for r in range(num_rel)]
    return pos_hs, neg_hs


def build_adj_counts(edge_index, num_nodes):
    """Dense raw edge-count adjacency: A[i, j] = #edges j -> i (duplicates counted)."""
    src, dst = edge_index  # message flows src -> dst
    adj = jnp.zeros((num_nodes, num_nodes), jnp.float32)
    return adj.at[dst, src].add(1.0)


if __name__ == "__main__":
    # Small, deterministic synthetic problem.  (Benchmark at realistic N=16-32K; at
    # N=256 the kernel is per-grid-step-overhead bound and tiling choices don't show.)
    N = 256        # number of head-node graph nodes
    F_IN = 64      # input feature dim
    H = 32         # hidden_channels
    R = 2          # number of relations (edge types)  -> output width R*2H = 128 lanes
    E = 1024       # edges per relation

    key = jax.random.PRNGKey(0)
    k_x, k_perm, key = jax.random.split(key, 3)

    x = jax.random.normal(k_x, (N, F_IN), jnp.float32)
    perm = jax.random.permutation(k_perm, N)

    # Deterministic per-relation SAGEConv parameters (glorot-ish init).
    params = []
    adjs = []
    for r in range(R):
        key, k_wl, k_wr, k_b, k_e = jax.random.split(key, 5)
        scale = (2.0 / (F_IN + H)) ** 0.5
        w_l = scale * jax.random.normal(k_wl, (F_IN, H), jnp.float32)
        w_r = scale * jax.random.normal(k_wr, (F_IN, H), jnp.float32)
        b_l = 0.01 * jax.random.normal(k_b, (H,), jnp.float32)
        params.append((w_l, w_r, b_l))
        edge_index = jax.random.randint(k_e, (2, E), 0, N)
        adjs.append(build_adj_counts(edge_index, N))

    pos_hs, neg_hs = dmgi_forward(x, adjs, params, perm)
    jax.block_until_ready((pos_hs, neg_hs))

    # Sanity check.  The adjacency counts are streamed exactly (small ints in int8/bf16);
    # only Yagg = X @ W_l is bf16-rounded, so the reference applies the same rounding.
    def _bf(v):
        return v.astype(jnp.bfloat16).astype(jnp.float32)

    ok = True
    x_perm = x[perm]
    for a_cnt, (w_l, w_r, b_l), ph, nh in zip(adjs, params, pos_hs, neg_hs):
        deg = jnp.maximum(a_cnt.sum(axis=1, keepdims=True), 1.0)
        ref_p = jnp.maximum((a_cnt @ _bf(x @ w_l)) / deg + x @ w_r + b_l, 0.0)
        ref_n = jnp.maximum((a_cnt @ _bf(x_perm @ w_l)) / deg + x_perm @ w_r + b_l, 0.0)
        ok &= bool(jnp.allclose(ph, ref_p, atol=1e-2, rtol=1e-2))
        ok &= bool(jnp.allclose(nh, ref_n, atol=1e-2, rtol=1e-2))
    assert ok, "Pallas kernel mismatch vs reference"
    # TODO(synk): training-mode dropout (p=0.5) not implemented; forward here is eval-mode.
    print("KERNEL_OK")
</pallas_src>

<mosaic_0001>
module attributes {stable_mosaic.version = 11 : i64} {
  func.func @kernel(%arg0: i32, %arg1: i32, %arg2: memref<256x256xi8, #tpu.memory_space<vmem>>, %arg3: memref<256x256xi8, #tpu.memory_space<vmem>>, %arg4: memref<256x64xbf16, #tpu.memory_space<vmem>>, %arg5: memref<256x64xbf16, #tpu.memory_space<vmem>>, %arg6: memref<256x128xf32, #tpu.memory_space<vmem>>, %arg7: memref<256x128xf32, #tpu.memory_space<vmem>>, %arg8: memref<256x128xf32, #tpu.memory_space<vmem>>, %arg9: memref<256x128xf32, #tpu.memory_space<vmem>>) attributes {dimension_semantics = [#tpu.dimension_semantics<parallel>, #tpu.dimension_semantics<arbitrary>], iteration_bounds = array<i64: 1, 1>, scalar_prefetch = 0 : i64, scratch_operands = 1 : i64, tpu.core_type = #tpu.core_type<tc>, window_params = [{transform_indices = @transform_0, window_bounds = array<i64: 256, 256>}, {transform_indices = @transform_1, window_bounds = array<i64: 256, 256>}, {pipeline_mode = #tpu.pipeline_mode<synchronous>, transform_indices = @transform_2, window_bounds = array<i64: 256, 64>}, {pipeline_mode = #tpu.pipeline_mode<synchronous>, transform_indices = @transform_3, window_bounds = array<i64: 256, 64>}, {transform_indices = @transform_4, window_bounds = array<i64: 256, 128>}, {transform_indices = @transform_5, window_bounds = array<i64: 256, 128>}, {transform_indices = @transform_6, window_bounds = array<i64: 256, 128>}]} {
    %c0_i32 = arith.constant 0 : i32
    %0 = arith.cmpi eq, %arg1, %c0_i32 : i32
    %1 = arith.extui %0 : i1 to i32
    %c0_i32_0 = arith.constant 0 : i32
    %2 = arith.cmpi ne, %1, %c0_i32_0 : i32
    scf.if %2 {
      %cst_13 = arith.constant 0.000000e+00 : f32
      %24 = vector.broadcast %cst_13 : f32 to vector<256x128xf32>
      %c0_14 = arith.constant 0 : index
      %c0_15 = arith.constant 0 : index
      %25 = vector.load %arg9[%c0_14, %c0_15] : memref<256x128xf32, #tpu.memory_space<vmem>>, vector<256x128xf32>
      tpu.vector_store %arg9[%c0_14, %c0_15], %24 {strides = array<i32>} : memref<256x128xf32, #tpu.memory_space<vmem>>, vector<256x128xf32>,
    } else {
    }
    %c256_i32 = arith.constant 256 : i32
    %3 = arith.muli %arg1, %c256_i32 : i32
    %4 = tpu.assume_multiple %3, 256 : i32
    %c0 = arith.constant 0 : index
    %c0_1 = arith.constant 0 : index
    %5 = vector.load %arg2[%c0, %c0_1] : memref<256x256xi8, #tpu.memory_space<vmem>>, vector<256x256xi8>
    %6 = arith.sitofp %5 : vector<256x256xi8> to vector<256x256xf32>
    %7 = arith.truncf %6 : vector<256x256xf32> to vector<256x256xbf16>
    %8 = arith.index_cast %4 : i32 to index
    %c0_2 = arith.constant 0 : index
    %9 = vector.load %arg4[%8, %c0_2] : memref<256x64xbf16, #tpu.memory_space<vmem>>, vector<256x64xbf16>
    %cst = arith.constant dense<0.000000e+00> : vector<256x64xf32>
    %10 = tpu.matmul %7, %9, %cst {dimension_numbers = #tpu.dot_dimension_numbers<[1], [0], [0], [1], [0, 0, 1, 1], [], []>} : vector<256x256xbf16>, vector<256x64xbf16>, vector<256x64xf32> -> vector<256x64xf32>
    %c0_3 = arith.constant 0 : index
    %c0_4 = arith.constant 0 : index
    %11 = vector.load %arg3[%c0_3, %c0_4] : memref<256x256xi8, #tpu.memory_space<vmem>>, vector<256x256xi8>
    %12 = arith.sitofp %11 : vector<256x256xi8> to vector<256x256xf32>
    %13 = arith.truncf %12 : vector<256x256xf32> to vector<256x256xbf16>
    %14 = arith.index_cast %4 : i32 to index
    %c0_5 = arith.constant 0 : index
    %15 = vector.load %arg5[%14, %c0_5] : memref<256x64xbf16, #tpu.memory_space<vmem>>, vector<256x64xbf16>
    %cst_6 = arith.constant dense<0.000000e+00> : vector<256x64xf32>
    %16 = tpu.matmul %13, %15, %cst_6 {dimension_numbers = #tpu.dot_dimension_numbers<[1], [0], [0], [1], [0, 0, 1, 1], [], []>} : vector<256x256xbf16>, vector<256x64xbf16>, vector<256x64xf32> -> vector<256x64xf32>
    %c0_7 = arith.constant 0 : index
    %c0_8 = arith.constant 0 : index
    %17 = vector.load %arg9[%c0_7, %c0_8] : memref<256x128xf32, #tpu.memory_space<vmem>>, vector<256x128xf32>
    %18 = tpu.concatenate %10, %16 in 1 : vector<256x64xf32>, vector<256x64xf32> -> vector<256x128xf32>
    %19 = arith.addf %17, %18 : vector<256x128xf32>
    %c0_9 = arith.constant 0 : index
    %c0_10 = arith.constant 0 : index
    %20 = vector.load %arg9[%c0_9, %c0_10] : memref<256x128xf32, #tpu.memory_space<vmem>>, vector<256x128xf32>
    tpu.vector_store %arg9[%c0_9, %c0_10], %19 {strides = array<i32>} : memref<256x128xf32, #tpu.memory_space<vmem>>, vector<256x128xf32>,
    %c0_i32_11 = arith.constant 0 : i32
    %21 = arith.cmpi eq, %arg1, %c0_i32_11 : i32
    %22 = arith.extui %21 : i1 to i32
    %c0_i32_12 = arith.constant 0 : i32
    %23 = arith.cmpi ne, %22, %c0_i32_12 : i32
    scf.if %23 {
      %c0_13 = arith.constant 0 : index
      %c0_14 = arith.constant 0 : index
      %24 = vector.load %arg9[%c0_13, %c0_14] : memref<256x128xf32, #tpu.memory_space<vmem>>, vector<256x128xf32>
      %c0_15 = arith.constant 0 : index
      %c0_16 = arith.constant 0 : index
      %25 = vector.load %arg6[%c0_15, %c0_16] : memref<256x128xf32, #tpu.memory_space<vmem>>, vector<256x128xf32>
      %26 = arith.mulf %24, %25 : vector<256x128xf32>
      %c0_17 = arith.constant 0 : index
      %c0_18 = arith.constant 0 : index
      %27 = vector.load %arg7[%c0_17, %c0_18] : memref<256x128xf32, #tpu.memory_space<vmem>>, vector<256x128xf32>
      %28 = arith.addf %26, %27 : vector<256x128xf32>
      %cst_19 = arith.constant 0.000000e+00 : f32
      %29 = vector.broadcast %cst_19 : f32 to vector<256x128xf32>
      %30 = arith.maximumf %28, %29 : vector<256x128xf32>
      %c0_20 = arith.constant 0 : index
      %c0_21 = arith.constant 0 : index
      %31 = vector.load %arg8[%c0_20, %c0_21] : memref<256x128xf32, #tpu.memory_space<vmem>>, vector<256x128xf32>
      tpu.vector_store %arg8[%c0_20, %c0_21], %30 {strides = array<i32>} : memref<256x128xf32, #tpu.memory_space<vmem>>, vector<256x128xf32>,
    } else {
    }
    return
  }
  func.func @transform_0(%arg0: i32, %arg1: i32) -> (i32, i32) {
    %c0_i32 = arith.constant 0 : i32
    return %arg0, %arg1 : i32, i32
  }
  func.func @transform_1(%arg0: i32, %arg1: i32) -> (i32, i32) {
    %c0_i32 = arith.constant 0 : i32
    return %arg0, %arg1 : i32, i32
  }
  func.func @transform_2(%arg0: i32, %arg1: i32) -> (i32, i32) {
    %c0_i32 = arith.constant 0 : i32
    %c0_i32_0 = arith.constant 0 : i32
    %c0_i32_1 = arith.constant 0 : i32
    return %c0_i32, %c0_i32_0 : i32, i32
  }
  func.func @transform_3(%arg0: i32, %arg1: i32) -> (i32, i32) {
    %c0_i32 = arith.constant 0 : i32
    %c0_i32_0 = arith.constant 0 : i32
    %c0_i32_1 = arith.constant 0 : i32
    return %c0_i32, %c0_i32_0 : i32, i32
  }
  func.func @transform_4(%arg0: i32, %arg1: i32) -> (i32, i32) {
    %c0_i32 = arith.constant 0 : i32
    %c0_i32_0 = arith.constant 0 : i32
    return %arg0, %c0_i32 : i32, i32
  }
  func.func @transform_5(%arg0: i32, %arg1: i32) -> (i32, i32) {
    %c0_i32 = arith.constant 0 : i32
    %c0_i32_0 = arith.constant 0 : i32
    return %arg0, %c0_i32 : i32, i32
  }
  func.func @transform_6(%arg0: i32, %arg1: i32) -> (i32, i32) {
    %c0_i32 = arith.constant 0 : i32
    %c0_i32_0 = arith.constant 0 : i32
    return %arg0, %c0_i32 : i32, i32
  }
}

</mosaic_0001>

<bundles_post_ra>
// kernel: tpu_custom_call.1
= control target key start
LH: loop header
LB: loop body
LE: loop exit
PB: predicated region body
PF: predicated region fallthrough
CT: control target
= control target key end

     0   :  { %11 = vsyncpa [#allocation4], 0  ;;  %s2159_s0 = inlined_call_operand.vmem [shape: s8[256,256], index: 0, kind: input, shape index: {}]   ;;  %s2160_s1 = inlined_call_operand.hbm [shape: s8[256,256], index: 1, kind: input, shape index: {}]   ;;  %s2161_s2 = inlined_call_operand.vmem [shape: bf16[256,64], index: 2, kind: input, shape index: {}]   ;;  %s2162_s3 = inlined_call_operand.vmem [shape: bf16[256,64], index: 3, kind: input, shape index: {}]   ;;  %s2163_s4 = inlined_call_operand.vmem [shape: f32[256,128], index: 4, kind: input, shape index: {}]   ;;  %s2164_s5 = inlined_call_operand.hbm [shape: f32[256,128], index: 5, kind: input, shape index: {}]   ;;  %s2165_s6 = inlined_call_operand.hbm [shape: f32[256,128], index: 6, kind: output, shape index: {}]  }
   0x1   :  { %12 = vsyncpa [#allocation7], 0 }
   0x2   :  { %13 = vsyncpa [#allocation5], 0  ;;  %s1638_s21 = smov [#allocation3]  }
   0x3   :  { %s21_s22 = sshll.u32 %s1638_s21, 4  ;;  %s22_s22 = int_to_ptr.vmem [resolvable:$true] %s21_s22 }
   0x4   :  { %s1580_s23 = scalar_lea.vmem %s22_s22, 2048  ;;  %p1585_p1 = scmp.lt.s32.totalorder %s22_s22, %s22_s22 }
   0x5   :  { %p1581_p0 = scmp.ne.s32.totalorder %s22_s22, %s1580_s23  ;;  %p1586_p2 = scmp.lt.s32.totalorder %s1580_s23, %s1580_s23 }
   0x7   :  { %p1587_p3 = por %p1586_p2, %p1585_p1 }
   0x9   :  { %p1588_p4 = pnand %p1587_p3, %p1581_p0 }
   0xb   :  { %1591 = shalt.err (!%p1588_p4)
}
   0xc   :  { %s1639_s24 = smov 256   ;;  %s1640_s25 = smov 16  }
   0xd   :  { %27 = dma.hbm_to_vmem [thread:$0]  %s2160_s1, 2048, %s22_s22, [#allocation4], %s1639_s24, %s1639_s24, %s1640_s25  }
   0xe   :  { %s1641_s28 = smov [#allocation6]  }
   0xf   :  { %s39_s29 = sshll.u32 %s1641_s28, 4  ;;  %s40_s29 = int_to_ptr.vmem [resolvable:$true] %s39_s29 }
  0x10   :  { %s1600_s30 = scalar_lea.vmem %s40_s29, 4096  ;;  %p1605_p6 = scmp.lt.s32.totalorder %s40_s29, %s40_s29 }
  0x11   :  { %p1601_p5 = scmp.ne.s32.totalorder %s40_s29, %s1600_s30  ;;  %p1606_p7 = scmp.lt.s32.totalorder %s1600_s30, %s1600_s30 }
  0x13   :  { %p1607_p8 = por %p1606_p7, %p1605_p6 }
  0x15   :  { %p1608_p9 = pnand %p1607_p8, %p1601_p5 }
  0x17   :  { %1611 = shalt.err (!%p1608_p9)
}
  0x18   :  { %s1642_s7 = smov 128   ;;  %s1643_s8 = smov 8  }
  0x19   :  { %45 = dma.hbm_to_vmem [thread:$0]  %s2164_s5, 4096, %s40_s29, [#allocation7], %s1642_s7, %s1642_s7, %s1643_s8  }
  0x1a   :  { %1632 = dma.done.wait [#allocation4], 2048  }
  0x1b   :  { %1633 = vsyncadd [#allocation4], 4294965248 }
  0x1c   :  { %1634 = dma.done.wait [#allocation7], 4096  }
  0x1d   :  { %1635 = vsyncadd [#allocation7], 4294963200  ;;  %v1540_v0 = vld [vmem:[%s2162_s3 + $0x78] sm:$0xff]   ;;  %v1542_v2 = vld [vmem:[%s2162_s3 + $0x70] sm:$0xff]   ;;  %vm930_vm0 = vcmask 523264   ;;  %s1645_s15 = smov [#allocation8]  }
  0x1e   :  { %v1541_v1 = vld [vmem:[%s2162_s3 + $0x38] sm:$0xff]   ;;  %1420 = vmatprep.subr.bf16.mxu1 %v1540_v0  ;;  %v1543_v3 = vld [vmem:[%s2162_s3 + $0x30] sm:$0xff]   ;;  %v1544_v4 = vld [vmem:[%s2162_s3 + $0x68] sm:$0xff]   ;;  %s1259_s16 = sshll.u32 %s1645_s15, 4  ;;  %s1260_s16 = int_to_ptr.vmem [resolvable:$true] %s1259_s16 }
  0x1f   :  { %1421 = vmatpush3.bf16.msra.mxu1 %v1541_v1  ;;  %v1545_v5 = vld [vmem:[%s2162_s3 + $0x28] sm:$0xff]   ;;  %v1546_v6 = vld [vmem:[%s2162_s3 + $0x60] sm:$0xff]   ;;  %v1548_v8 = vld [vmem:[%s2162_s3 + $0x58] sm:$0xff]   ;;  %s1612_s5 = scalar_lea.vmem %s1260_s16, 4096  ;;  %p1617_p11 = scmp.lt.s32.totalorder %s1260_s16, %s1260_s16 }
  0x20   :  { %1422 = vmatprep.subr.bf16.mxu1 %v1542_v2  ;;  %v1547_v7 = vld [vmem:[%s2162_s3 + $0x20] sm:$0xff]   ;;  %v1549_v9 = vld [vmem:[%s2162_s3 + $0x18] sm:$0xff]   ;;  %v1550_v10 = vld [vmem:[%s2162_s3 + $0x50] sm:$0xff]   ;;  %p1613_p10 = scmp.ne.s32.totalorder %s1260_s16, %s1612_s5  ;;  %p1618_p12 = scmp.lt.s32.totalorder %s1612_s5, %s1612_s5 }
  0x21   :  { %v432_v11 = vld [vmem:[#allocation3 + $0x8] sm:$0xff]  ;;  %v1551_v13 = vld [vmem:[%s2162_s3 + $0x10] sm:$0xff]   ;;  %v1556_v15 = vld [vmem:[%s2161_s2 + $0x78] sm:$0xff]  }
  0x22   :  { %v448_v12 = vunpack.c.l.s8.bf16 %v432_v11  ;;  %v1552_v14 = vld [vmem:[%s2162_s3 + $0x48] sm:$0xff]   ;;  %v1557_v17 = vld [vmem:[%s2161_s2 + $0x38] sm:$0xff]   ;;  %v1554_v18 = vld [vmem:[%s2162_s3 + $0x40] sm:$0xff]   ;;  %1308 = vmatprep.subr.bf16.mxu0 %v1556_v15  ;;  %v450_v27 = vunpack.c.h.s8.bf16 %v432_v11  ;;  %p1619_p13 = por %p1618_p12, %p1617_p11 }
  0x23   :  { %1423 = vmatpush3.bf16.msra.mxu1 %v1543_v3  ;;  %v1553_v16 = vld [vmem:[%s2162_s3 + $0x8] sm:$0xff]   ;;  %v1558_v19 = vld [vmem:[%s2161_s2 + $0x70] sm:$0xff]   ;;  %1309 = vmatpush3.bf16.msra.mxu0 %v1557_v17  ;;  %v1555_v22 = vld [vmem:[%s2162_s3] sm:$0xff]  }
  0x24   :  { %1424 = vmatprep.subr.bf16.mxu1 %v1544_v4  ;;  %641 = vmatprep.mubr.bf16.mxu1 %v448_v12  ;;  %v1559_v20 = vld [vmem:[%s2161_s2 + $0x30] sm:$0xff]   ;;  %v1560_v21 = vld [vmem:[%s2161_s2 + $0x68] sm:$0xff]   ;;  %v431_v23 = vld [vmem:[#allocation3] sm:$0xff]  ;;  %p1620_p0 = pnand %p1619_p13, %p1613_p10 }
  0x25   :  { %1310 = vmatprep.subr.bf16.mxu0 %v1558_v19  ;;  %v1561_v24 = vld [vmem:[%s2161_s2 + $0x28] sm:$0xff]   ;;  %v1562_v25 = vld [vmem:[%s2161_s2 + $0x60] sm:$0xff]   ;;  %v447_v26 = vunpack.c.l.s8.bf16 %v431_v23  ;;  %v1564_v29 = vld [vmem:[%s2161_s2 + $0x58] sm:$0xff]   ;;  %v449_v35 = vunpack.c.h.s8.bf16 %v431_v23 }
  0x26   :  { %v1563_v28 = vld [vmem:[%s2161_s2 + $0x20] sm:$0xff]   ;;  %v434_v30 = vld [vmem:[#allocation3 + $0x18] sm:$0xff]  ;;  %v1566_v32 = vld [vmem:[%s2161_s2 + $0x50] sm:$0xff]  }
  0x27   :  { %1425 = vmatpush3.bf16.msra.mxu1 %v1545_v5  ;;  %1311 = vmatpush3.bf16.msra.mxu0 %v1559_v20  ;;  %v1565_v31 = vld [vmem:[%s2161_s2 + $0x18] sm:$0xff]   ;;  %v91_v33 = vld [vmem:[%s2159_s0 + $0x8] sm:$0xff]  ;;  %v452_v36 = vunpack.c.l.s8.bf16 %v434_v30  ;;  %v1567_v37 = vld [vmem:[%s2161_s2 + $0x10] sm:$0xff]   ;;  %v454_v43 = vunpack.c.h.s8.bf16 %v434_v30 }
  0x28   :  { %1426 = vmatprep.subr.bf16.mxu1 %v1546_v6  ;;  %1312 = vmatprep.subr.bf16.mxu0 %v1560_v21  ;;  %v107_v34 = vunpack.c.l.s8.bf16 %v91_v33  ;;  %v1568_v38 = vld [vmem:[%s2161_s2 + $0x48] sm:$0xff]   ;;  %v433_v39 = vld [vmem:[#allocation3 + $0x10] sm:$0xff]  ;;  %v1570_v41 = vld [vmem:[%s2161_s2 + $0x40] sm:$0xff]   ;;  %v109_v47 = vunpack.c.h.s8.bf16 %v91_v33 }
  0x29   :  { %v1569_v40 = vld [vmem:[%s2161_s2 + $0x8] sm:$0xff]   ;;  %v451_v42 = vunpack.c.l.s8.bf16 %v433_v39  ;;  %v1571_v44 = vld [vmem:[%s2161_s2] sm:$0xff]   ;;  %v453_v49 = vunpack.c.h.s8.bf16 %v433_v39  ;;  %v93_v51 = vld [vmem:[%s2159_s0 + $0x18] sm:$0xff]  ;;  %s1644_s2 = smov 64  }
  0x2a   :  { %302 = vmatprep.mubr.bf16.mxu0 %v107_v34  ;;  %v90_v45 = vld [vmem:[%s2159_s0] sm:$0xff]  ;;  %v436_v48 = vld [vmem:[#allocation3 + $0x28] sm:$0xff]  ;;  %v111_v54 = vunpack.c.l.s8.bf16 %v93_v51  ;;  %v92_v57 = vld [vmem:[%s2159_s0 + $0x10] sm:$0xff]  ;;  %v113_v59 = vunpack.c.h.s8.bf16 %v93_v51 }
  0x2b   :  { %1427 = vmatpush3.bf16.msra.mxu1 %v1547_v7  ;;  %1313 = vmatpush3.bf16.msra.mxu0 %v1561_v24  ;;  %v106_v46 = vunpack.c.l.s8.bf16 %v90_v45  ;;  %v456_v50 = vunpack.c.l.s8.bf16 %v436_v48  ;;  %v108_v52 = vunpack.c.h.s8.bf16 %v90_v45  ;;  %v435_v53 = vld [vmem:[#allocation3 + $0x20] sm:$0xff]  ;;  %v458_v56 = vunpack.c.h.s8.bf16 %v436_v48  ;;  %v438_v60 = vld [vmem:[#allocation3 + $0x38] sm:$0xff]  ;;  %v95_v63 = vld [vmem:[%s2159_s0 + $0x28] sm:$0xff] }
  0x2c   :  { %1428 = vmatprep.subr.bf16.mxu1 %v1548_v8  ;;  %1314 = vmatprep.subr.bf16.mxu0 %v1562_v25  ;;  %v455_v55 = vunpack.c.l.s8.bf16 %v435_v53  ;;  %v110_v58 = vunpack.c.l.s8.bf16 %v92_v57  ;;  %v457_v61 = vunpack.c.h.s8.bf16 %v435_v53  ;;  %v460_v62 = vunpack.c.l.s8.bf16 %v438_v60  ;;  %v437_v1 = vld [vmem:[#allocation3 + $0x30] sm:$0xff]  ;;  %v94_v5 = vld [vmem:[%s2159_s0 + $0x20] sm:$0xff]  ;;  %v440_v8 = vld [vmem:[#allocation3 + $0x48] sm:$0xff] }
  0x2d   :  { %v112_v0 = vunpack.c.h.s8.bf16 %v92_v57  ;;  %v115_v2 = vunpack.c.l.s8.bf16 %v95_v63  ;;  %v459_v3 = vunpack.c.l.s8.bf16 %v437_v1  ;;  %v462_v4 = vunpack.c.h.s8.bf16 %v438_v60  ;;  %v97_v11 = vld [vmem:[%s2159_s0 + $0x38] sm:$0xff]  ;;  %v96_v17 = vld [vmem:[%s2159_s0 + $0x30] sm:$0xff]  ;;  %v99_v23 = vld [vmem:[%s2159_s0 + $0x48] sm:$0xff] }
  0x2e   :  { %v114_v6 = vunpack.c.l.s8.bf16 %v94_v5  ;;  %v117_v7 = vunpack.c.h.s8.bf16 %v95_v63  ;;  %v116_v12 = vunpack.c.h.s8.bf16 %v94_v5  ;;  %v121_v19 = vunpack.c.h.s8.bf16 %v97_v11  ;;  %v442_v20 = vld [vmem:[#allocation3 + $0x58] sm:$0xff]  ;;  %v441_v25 = vld [vmem:[#allocation3 + $0x50] sm:$0xff]  ;;  %v102_v53 = vld [vmem:[%s2159_s0 + $0x60] sm:$0xff] }
  0x2f   :  { %1429 = vmatpush3.bf16.msra.mxu1 %v1549_v9  ;;  %1315 = vmatpush3.bf16.msra.mxu0 %v1563_v28  ;;  %v461_v9 = vunpack.c.h.s8.bf16 %v437_v1  ;;  %v120_v24 = vunpack.c.h.s8.bf16 %v96_v17  ;;  %v470_v28 = vunpack.c.h.s8.bf16 %v442_v20  ;;  %v469_v33 = vunpack.c.h.s8.bf16 %v441_v25  ;;  %v105_v57 = vld [vmem:[%s2159_s0 + $0x78] sm:$0xff]  ;;  %v104_v60 = vld [vmem:[%s2159_s0 + $0x70] sm:$0xff] }
  0x30   :  { %1430 = vmatprep.subr.bf16.mxu1 %v1550_v10  ;;  %1316 = vmatprep.subr.bf16.mxu0 %v1564_v29  ;;  %v464_v10 = vunpack.c.l.s8.bf16 %v440_v8  ;;  %v98_v29 = vld [vmem:[%s2159_s0 + $0x40] sm:$0xff]  ;;  %v136_v63 = vunpack.c.h.s8.bf16 %v104_v60 }
  0x31   :  { %v122_v30 = vunpack.c.l.s8.bf16 %v98_v29 }
  0x33   :  { %1431 = vmatpush3.bf16.msra.mxu1 %v1551_v13  ;;  %1317 = vmatpush3.bf16.msra.mxu0 %v1565_v31  ;;  %v439_v13 = vld [vmem:[#allocation3 + $0x40] sm:$0xff]  ;;  %v125_v31 = vunpack.c.h.s8.bf16 %v99_v23 }
  0x34   :  { %1432 = vmatprep.subr.bf16.mxu1 %v1552_v14  ;;  %1318 = vmatprep.subr.bf16.mxu0 %v1566_v32  ;;  %v119_v14 = vunpack.c.l.s8.bf16 %v97_v11  ;;  %v463_v15 = vunpack.c.l.s8.bf16 %v439_v13  ;;  %v465_v21 = vunpack.c.h.s8.bf16 %v439_v13  ;;  %v444_v32 = vld [vmem:[#allocation3 + $0x68] sm:$0xff] }
  0x35   :  { %v472_v34 = vunpack.c.l.s8.bf16 %v444_v32 }
  0x37   :  { %1433 = vmatpush3.bf16.msra.mxu1 %v1553_v16  ;;  %1319 = vmatpush3.bf16.msra.mxu0 %v1567_v37  ;;  %v466_v16 = vunpack.c.h.s8.bf16 %v440_v8  ;;  %v443_v37 = vld [vmem:[#allocation3 + $0x60] sm:$0xff] }
  0x38   :  { %1434 = vmatprep.subr.bf16.mxu1 %v1554_v18  ;;  %1320 = vmatprep.subr.bf16.mxu0 %v1568_v38  ;;  %v118_v18 = vunpack.c.l.s8.bf16 %v96_v17  ;;  %v471_v39 = vunpack.c.l.s8.bf16 %v443_v37  ;;  %v473_v45 = vunpack.c.h.s8.bf16 %v443_v37 }
  0x3b   :  { %1435 = vmatpush3.bf16.msra.mxu1 %v1555_v22  ;;  %1321 = vmatpush3.bf16.msra.mxu0 %v1569_v40  ;;  %v468_v22 = vunpack.c.l.s8.bf16 %v442_v20  ;;  %v474_v40 = vunpack.c.h.s8.bf16 %v444_v32 }
  0x3c   :  { %1322 = vmatprep.subr.bf16.mxu0 %v1570_v41  ;;  %v100_v41 = vld [vmem:[%s2159_s0 + $0x50] sm:$0xff] }
  0x3d   :  { %v128_v48 = vunpack.c.h.s8.bf16 %v100_v41 }
  0x3e   :  { %642 = vmatmul.mubr.bf16.vlgmr.msra.gmra.mxu1 %v447_v26  ;;  %v123_v26 = vunpack.c.l.s8.bf16 %v99_v23 }
  0x3f   :  { %649 = vmatprep.mubr.bf16.mxu1 %v450_v27  ;;  %1323 = vmatpush3.bf16.msra.mxu0 %v1571_v44  ;;  %v467_v27 = vunpack.c.l.s8.bf16 %v441_v25  ;;  %v446_v44 = vld [vmem:[#allocation3 + $0x78] sm:$0xff] }
  0x42   :  { %303 = vmatmul.mubr.bf16.vlgmr.msra.gmra.mxu0 %v106_v46  ;;  %v476_v46 = vunpack.c.l.s8.bf16 %v446_v44 }
  0x43   :  { %310 = vmatprep.mubr.bf16.mxu0 %v109_v47  ;;  %v103_v47 = vld [vmem:[%s2159_s0 + $0x68] sm:$0xff] }
  0x46   :  { %650 = vmatmul.mubr.bf16.gmra.mxu1 %v449_v35  ;;  %v101_v35 = vld [vmem:[%s2159_s0 + $0x58] sm:$0xff] }
  0x47   :  { %657 = vmatprep.mubr.bf16.mxu1 %v452_v36  ;;  %v124_v36 = vunpack.c.h.s8.bf16 %v98_v29  ;;  %v127_v38 = vunpack.c.l.s8.bf16 %v101_v35 }
  0x4a   :  { %311 = vmatmul.mubr.bf16.gmra.mxu0 %v108_v52  ;;  %v478_v52 = vunpack.c.h.s8.bf16 %v446_v44 }
  0x4b   :  { %318 = vmatprep.mubr.bf16.mxu0 %v111_v54  ;;  %v130_v54 = vunpack.c.l.s8.bf16 %v102_v53 }
  0x4e   :  { %658 = vmatmul.mubr.bf16.gmra.mxu1 %v451_v42  ;;  %v126_v42 = vunpack.c.l.s8.bf16 %v100_v41 }
  0x4f   :  { %665 = vmatprep.mubr.bf16.mxu1 %v454_v43  ;;  %v129_v43 = vunpack.c.h.s8.bf16 %v101_v35 }
  0x52   :  { %319 = vmatmul.mubr.bf16.gmra.mxu0 %v110_v58  ;;  %v132_v58 = vunpack.c.h.s8.bf16 %v102_v53 }
  0x53   :  { %326 = vmatprep.mubr.bf16.mxu0 %v113_v59  ;;  %v135_v59 = vunpack.c.l.s8.bf16 %v105_v57 }
  0x56   :  { %666 = vmatmul.mubr.bf16.gmra.mxu1 %v453_v49  ;;  %v445_v49 = vld [vmem:[#allocation3 + $0x70] sm:$0xff] }
  0x57   :  { %673 = vmatprep.mubr.bf16.mxu1 %v456_v50  ;;  %v131_v50 = vunpack.c.l.s8.bf16 %v103_v47  ;;  %v475_v51 = vunpack.c.l.s8.bf16 %v445_v49 }
  0x5a   :  { %327 = vmatmul.mubr.bf16.gmra.mxu0 %v112_v0 }
  0x5b   :  { %334 = vmatprep.mubr.bf16.mxu0 %v115_v2 }
  0x5e   :  { %674 = vmatmul.mubr.bf16.gmra.mxu1 %v455_v55  ;;  %v133_v55 = vunpack.c.h.s8.bf16 %v103_v47 }
  0x5f   :  { %681 = vmatprep.mubr.bf16.mxu1 %v458_v56  ;;  %v477_v56 = vunpack.c.h.s8.bf16 %v445_v49 }
  0x62   :  { %335 = vmatmul.mubr.bf16.gmra.mxu0 %v114_v6 }
  0x63   :  { %342 = vmatprep.mubr.bf16.mxu0 %v117_v7 }
  0x66   :  { %682 = vmatmul.mubr.bf16.gmra.mxu1 %v457_v61  ;;  %v134_v61 = vunpack.c.l.s8.bf16 %v104_v60 }
  0x67   :  { %689 = vmatprep.mubr.bf16.mxu1 %v460_v62  ;;  %v137_v62 = vunpack.c.h.s8.bf16 %v105_v57 }
  0x6a   :  { %343 = vmatmul.mubr.bf16.gmra.mxu0 %v116_v12 }
  0x6b   :  { %350 = vmatprep.mubr.bf16.mxu0 %v119_v14 }
  0x6e   :  { %690 = vmatmul.mubr.bf16.gmra.mxu1 %v459_v3 }
  0x6f   :  { %697 = vmatprep.mubr.bf16.mxu1 %v462_v4 }
  0x72   :  { %351 = vmatmul.mubr.bf16.gmra.mxu0 %v118_v18 }
  0x73   :  { %358 = vmatprep.mubr.bf16.mxu0 %v121_v19 }
  0x76   :  { %698 = vmatmul.mubr.bf16.gmra.mxu1 %v461_v9 }
  0x77   :  { %705 = vmatprep.mubr.bf16.mxu1 %v464_v10 }
  0x7a   :  { %359 = vmatmul.mubr.bf16.gmra.mxu0 %v120_v24 }
  0x7b   :  { %366 = vmatprep.mubr.bf16.mxu0 %v123_v26 }
  0x7e   :  { %706 = vmatmul.mubr.bf16.gmra.mxu1 %v463_v15 }
  0x7f   :  { %713 = vmatprep.mubr.bf16.mxu1 %v466_v16 }
  0x82   :  { %367 = vmatmul.mubr.bf16.gmra.mxu0 %v122_v30 }
  0x83   :  { %374 = vmatprep.mubr.bf16.mxu0 %v125_v31 }
  0x86   :  { %714 = vmatmul.mubr.bf16.gmra.mxu1 %v465_v21 }
  0x87   :  { %721 = vmatprep.mubr.bf16.mxu1 %v468_v22 }
  0x8a   :  { %375 = vmatmul.mubr.bf16.gmra.mxu0 %v124_v36 }
  0x8b   :  { %382 = vmatprep.mubr.bf16.mxu0 %v127_v38 }
  0x8e   :  { %722 = vmatmul.mubr.bf16.gmra.mxu1 %v467_v27 }
  0x8f   :  { %729 = vmatprep.mubr.bf16.mxu1 %v470_v28 }
  0x92   :  { %383 = vmatmul.mubr.bf16.gmra.mxu0 %v126_v42 }
  0x93   :  { %390 = vmatprep.mubr.bf16.mxu0 %v129_v43 }
  0x96   :  { %730 = vmatmul.mubr.bf16.gmra.mxu1 %v469_v33 }
  0x97   :  { %737 = vmatprep.mubr.bf16.mxu1 %v472_v34 }
  0x9a   :  { %391 = vmatmul.mubr.bf16.gmra.mxu0 %v128_v48 }
  0x9b   :  { %398 = vmatprep.mubr.bf16.mxu0 %v131_v50 }
  0x9e   :  { %738 = vmatmul.mubr.bf16.gmra.mxu1 %v471_v39 }
  0x9f   :  { %745 = vmatprep.mubr.bf16.mxu1 %v474_v40 }
  0xa2   :  { %399 = vmatmul.mubr.bf16.gmra.mxu0 %v130_v54 }
  0xa3   :  { %406 = vmatprep.mubr.bf16.mxu0 %v133_v55 }
  0xa6   :  { %746 = vmatmul.mubr.bf16.gmra.mxu1 %v473_v45 }
  0xa7   :  { %753 = vmatprep.mubr.bf16.mxu1 %v476_v46 }
  0xaa   :  { %407 = vmatmul.mubr.bf16.gmra.mxu0 %v132_v58 }
  0xab   :  { %414 = vmatprep.mubr.bf16.mxu0 %v135_v59 }
  0xae   :  { %754 = vmatmul.mubr.bf16.gmra.mxu1 %v475_v51 }
  0xaf   :  { %761 = vmatprep.mubr.bf16.mxu1 %v478_v52 }
  0xb2   :  { %415 = vmatmul.mubr.bf16.gmra.mxu0 %v134_v61 }
  0xb3   :  { %422 = vmatprep.mubr.bf16.mxu0 %v137_v62 }
  0xb6   :  { %762 = vmatmul.mubr.bf16.gmra.mxu1 %v477_v56 }
  0xba   :  { %423 = vmatmul.mubr.bf16.gmra.mxu0 %v136_v63 }
  0xfe   :  { %v1436_v0 = vpop.f32.mrf.mxu1 }
 0x100   :  { %v1437_v1 = vpop.f32.mrf.mxu1 }
 0x101   :  { %v1438_v2 = vadd.f32 %v1437_v1, %v1436_v0 }
 0x102   :  { %v1439_v3 = vpop.f32.mrf.mxu1  ;;  %v1838_v16 = vpop.f32.mrf.mxu0 }
 0x103   :  { %834 = vrot.lane.b32.xlu0 %v1438_v2, %s1644_s2 }
 0x104   :  { %v1440_v4 = vpop.f32.mrf.mxu1  ;;  %v1841_v18 = vpop.f32.mrf.mxu0 }
 0x105   :  { %v1441_v5 = vadd.f32 %v1440_v4, %v1439_v3 }
 0x106   :  { %v1442_v6 = vpop.f32.mrf.mxu1  ;;  %v1843_v21 = vpop.f32.mrf.mxu0 }
 0x107   :  { %836 = vrot.lane.b32.xlu0 %v1441_v5, %s1644_s2 }
 0x108   :  { %v1443_v7 = vpop.f32.mrf.mxu1  ;;  %v1846_v23 = vpop.f32.mrf.mxu0 }
 0x109   :  { %v1444_v8 = vadd.f32 %v1443_v7, %v1442_v6 }
 0x10a   :  { %v1445_v9 = vpop.f32.mrf.mxu1  ;;  %v1848_v26 = vpop.f32.mrf.mxu0 }
 0x10b   :  { %838 = vrot.lane.b32.xlu1 %v1444_v8, %s1644_s2 }
 0x10c   :  { %v1446_v10 = vpop.f32.mrf.mxu1  ;;  %v1851_v28 = vpop.f32.mrf.mxu0 }
 0x10d   :  { %v1447_v11 = vadd.f32 %v1446_v10, %v1445_v9 }
 0x10e   :  { %v1448_v12 = vpop.f32.mrf.mxu1  ;;  %v1853_v31 = vpop.f32.mrf.mxu0 }
 0x10f   :  { %840 = vrot.lane.b32.xlu1 %v1447_v11, %s1644_s2 }
 0x110   :  { %v1449_v13 = vpop.f32.mrf.mxu1  ;;  %v1856_v33 = vpop.f32.mrf.mxu0 }
 0x111   :  { %v1450_v14 = vadd.f32 %v1449_v13, %v1448_v12 }
 0x112   :  { %v1451_v15 = vpop.f32.mrf.mxu1  ;;  %v1858_v36 = vpop.f32.mrf.mxu0 }
 0x113   :  { %842 = vrot.lane.b32.xlu0 %v1450_v14, %s1644_s2 }
 0x114   :  { %v1452_v17 = vpop.f32.mrf.mxu1  ;;  %v1861_v38 = vpop.f32.mrf.mxu0 }
 0x115   :  { %v1453_v19 = vadd.f32 %v1452_v17, %v1451_v15 }
 0x116   :  { %v1454_v20 = vpop.f32.mrf.mxu1  ;;  %v1863_v41 = vpop.f32.mrf.mxu0 }
 0x117   :  { %844 = vrot.lane.b32.xlu1 %v1453_v19, %s1644_s2 }
 0x118   :  { %v1455_v22 = vpop.f32.mrf.mxu1  ;;  %v1866_v43 = vpop.f32.mrf.mxu0 }
 0x119   :  { %v1456_v24 = vadd.f32 %v1455_v22, %v1454_v20 }
 0x11a   :  { %v1457_v25 = vpop.f32.mrf.mxu1  ;;  %v1868_v46 = vpop.f32.mrf.mxu0 }
 0x11b   :  { %846 = vrot.lane.b32.xlu0 %v1456_v24, %s1644_s2 }
 0x11c   :  { %v1458_v27 = vpop.f32.mrf.mxu1  ;;  %v1871_v48 = vpop.f32.mrf.mxu0 }
 0x11d   :  { %v1459_v29 = vadd.f32 %v1458_v27, %v1457_v25 }
 0x11e   :  { %v1460_v30 = vpop.f32.mrf.mxu1  ;;  %v1873_v51 = vpop.f32.mrf.mxu0 }
 0x11f   :  { %848 = vrot.lane.b32.xlu1 %v1459_v29, %s1644_s2 }
 0x120   :  { %v1461_v32 = vpop.f32.mrf.mxu1  ;;  %v1876_v53 = vpop.f32.mrf.mxu0 }
 0x121   :  { %v1462_v34 = vadd.f32 %v1461_v32, %v1460_v30 }
 0x122   :  { %v1463_v35 = vpop.f32.mrf.mxu1  ;;  %v1878_v56 = vpop.f32.mrf.mxu0 }
 0x123   :  { %850 = vrot.lane.b32.xlu0 %v1462_v34, %s1644_s2 }
 0x124   :  { %v1464_v37 = vpop.f32.mrf.mxu1  ;;  %v1881_v59 = vpop.f32.mrf.mxu0 }
 0x125   :  { %v1465_v39 = vadd.f32 %v1464_v37, %v1463_v35 }
 0x126   :  { %v1466_v40 = vpop.f32.mrf.mxu1  ;;  %v1884_v63 = vpop.f32.mrf.mxu0 }
 0x127   :  { %852 = vrot.lane.b32.xlu1 %v1465_v39, %s1644_s2 }
 0x128   :  { %v1467_v42 = vpop.f32.mrf.mxu1  ;;  %v1887_v3 = vpop.f32.mrf.mxu0 }
 0x129   :  { %v1468_v44 = vadd.f32 %v1467_v42, %v1466_v40 }
 0x12a   :  { %v1469_v45 = vpop.f32.mrf.mxu1  ;;  %v1890_v7 = vpop.f32.mrf.mxu0 }
 0x12b   :  { %854 = vrot.lane.b32.xlu0 %v1468_v44, %s1644_s2 }
 0x12c   :  { %v1470_v47 = vpop.f32.mrf.mxu1  ;;  %v1893_v11 = vpop.f32.mrf.mxu0 }
 0x12d   :  { %v1471_v49 = vadd.f32 %v1470_v47, %v1469_v45 }
 0x12e   :  { %v1472_v50 = vpop.f32.mrf.mxu1  ;;  %v1896_v15 = vpop.f32.mrf.mxu0 }
 0x12f   :  { %856 = vrot.lane.b32.xlu1 %v1471_v49, %s1644_s2 }
 0x130   :  { %v1473_v52 = vpop.f32.mrf.mxu1  ;;  %v1899_v22 = vpop.f32.mrf.mxu0 }
 0x131   :  { %v1474_v54 = vadd.f32 %v1473_v52, %v1472_v50 }
 0x132   :  { %v1475_v55 = vpop.f32.mrf.mxu1  ;;  %v1902_v29 = vpop.f32.mrf.mxu0 }
 0x133   :  { %858 = vrot.lane.b32.xlu0 %v1474_v54, %s1644_s2 }
 0x134   :  { %v1476_v57 = vpop.f32.mrf.mxu1  ;;  %v1905_v35 = vpop.f32.mrf.mxu0 }
 0x135   :  { %v1477_v58 = vadd.f32 %v1476_v57, %v1475_v55 }
 0x136   :  { %v1478_v60 = vpop.f32.mrf.mxu1  ;;  %v1908_v42 = vpop.f32.mrf.mxu0 }
 0x137   :  { %860 = vrot.lane.b32.xlu1 %v1477_v58, %s1644_s2 }
 0x138   :  { %v1479_v61 = vpop.f32.mrf.mxu1  ;;  %v1911_v49 = vpop.f32.mrf.mxu0 }
 0x139   :  { %v1480_v62 = vadd.f32 %v1479_v61, %v1478_v60 }
 0x13a   :  { %v1481_v0 = vpop.f32.mrf.mxu1  ;;  %v1914_v55 = vpop.f32.mrf.mxu0 }
 0x13b   :  { %862 = vrot.lane.b32.xlu0 %v1480_v62, %s1644_s2 }
 0x13c   :  { %v1482_v1 = vpop.f32.mrf.mxu1  ;;  %v1917_v61 = vpop.f32.mrf.mxu0 }
 0x13d   :  { %v1483_v2 = vadd.f32 %v1482_v1, %v1481_v0 }
 0x13e   :  { %v1484_v4 = vpop.f32.mrf.mxu1 }
 0x13f   :  { %864 = vrot.lane.b32.xlu1 %v1483_v2, %s1644_s2  ;;  %v1920_v2 = vpop.f32.mrf.mxu0 }
 0x140   :  { %v1485_v5 = vpop.f32.mrf.mxu1 }
 0x141   :  { %v1486_v6 = vadd.f32 %v1485_v5, %v1484_v4 }
 0x142   :  { %v1487_v8 = vpop.f32.mrf.mxu1 }
 0x143   :  { %866 = vrot.lane.b32.xlu0 %v1486_v6, %s1644_s2 }
 0x144   :  { %v1488_v9 = vpop.f32.mrf.mxu1 }
 0x145   :  { %v1489_v10 = vadd.f32 %v1488_v9, %v1487_v8  ;;  %v1923_v8 = vpop.f32.mrf.mxu0 }
 0x146   :  { %v1490_v12 = vpop.f32.mrf.mxu1 }
 0x147   :  { %868 = vrot.lane.b32.xlu1 %v1489_v10, %s1644_s2 }
 0x148   :  { %v1491_v13 = vpop.f32.mrf.mxu1 }
 0x149   :  { %v1492_v14 = vadd.f32 %v1491_v13, %v1490_v12  ;;  %v1926_v13 = vpop.f32.mrf.mxu0 }
 0x14a   :  { %v1493_v17 = vpop.f32.mrf.mxu1 }
 0x14b   :  { %870 = vrot.lane.b32.xlu0 %v1492_v14, %s1644_s2 }
 0x14c   :  { %v1494_v19 = vpop.f32.mrf.mxu1 }
 0x14d   :  { %v1495_v20 = vadd.f32 %v1494_v19, %v1493_v17  ;;  %v1326_v17 = vadd.f32 %v1841_v18, %v1838_v16  ;;  %v1063_v18 = vld [vmem:[%s2163_s4 + $0x8] sm:$0xff] }
 0x14e   :  { %v1496_v24 = vpop.f32.mrf.mxu1 }
 0x14f   :  { %872 = vrot.lane.b32.xlu1 %v1495_v20, %s1644_s2  ;;  %v1062_v20 = vld [vmem:[%s2163_s4] sm:$0xff] }
 0x150   :  { %v1497_v25 = vpop.f32.mrf.mxu1 }
 0x151   :  { %v1498_v27 = vadd.f32 %v1497_v25, %v1496_v24 }
 0x152   :  { %v1499_v30 = vpop.f32.mrf.mxu1 }
 0x153   :  { %874 = vrot.lane.b32.xlu0 %v1498_v27, %s1644_s2  ;;  %v1934_v27 = vpop.f32.mrf.mxu0 }
 0x154   :  { %v1500_v32 = vpop.f32.mrf.mxu1 }
 0x155   :  { %v1501_v34 = vadd.f32 %v1500_v32, %v1499_v30  ;;  %v1126_v30 = vld [vmem:[#allocation6] sm:$0xff] }
 0x156   :  { %v1502_v37 = vpop.f32.mrf.mxu1 }
 0x157   :  { %876 = vrot.lane.b32.xlu1 %v1501_v34, %s1644_s2 }
 0x158   :  { %v1503_v39 = vpop.f32.mrf.mxu1 }
 0x159   :  { %v1504_v40 = vadd.f32 %v1503_v39, %v1502_v37  ;;  %v1329_v39 = vadd.f32 %v1846_v23, %v1843_v21  ;;  %v1332_v21 = vadd.f32 %v1851_v28, %v1848_v26  ;;  %v1335_v26 = vadd.f32 %v1856_v33, %v1853_v31  ;;  %v1065_v28 = vld [vmem:[%s2163_s4 + $0x18] sm:$0xff]  ;;  %v1066_v31 = vld [vmem:[%s2163_s4 + $0x20] sm:$0xff] }
 0x15a   :  { %v1505_v44 = vpop.f32.mrf.mxu1 }
 0x15b   :  { %878 = vrot.lane.b32.xlu0 %v1504_v40, %s1644_s2 }
 0x15c   :  { %v1506_v45 = vpop.f32.mrf.mxu1 }
 0x15d   :  { %v1507_v47 = vadd.f32 %v1506_v45, %v1505_v44 }
 0x15e   :  { %v1508_v50 = vpop.f32.mrf.mxu1 }
 0x15f   :  { %880 = vrot.lane.b32.xlu1 %v1507_v47, %s1644_s2  ;;  %v1943_v47 = vpop.f32.mrf.mxu0 }
 0x160   :  { %v1509_v52 = vpop.f32.mrf.mxu1 }
 0x161   :  { %v1510_v54 = vadd.f32 %v1509_v52, %v1508_v50  ;;  %v1127_v50 = vld [vmem:[#allocation6 + $0x8] sm:$0xff] }
 0x162   :  { %v1511_v57 = vpop.f32.mrf.mxu1 }
 0x163   :  { %882 = vrot.lane.b32.xlu0 %v1510_v54, %s1644_s2 }
 0x164   :  { %v1512_v58 = vpop.f32.mrf.mxu1 }
 0x165   :  { %v1513_v60 = vadd.f32 %v1512_v58, %v1511_v57 }
 0x166   :  { %v1514_v62 = vpop.f32.mrf.mxu1 }
 0x167   :  { %884 = vrot.lane.b32.xlu1 %v1513_v60, %s1644_s2  ;;  %v1064_v60 = vld [vmem:[%s2163_s4 + $0x10] sm:$0xff] }
 0x168   :  { %v1515_v0 = vpop.f32.mrf.mxu1 }
 0x169   :  { %v1516_v1 = vadd.f32 %v1515_v0, %v1514_v62 }
 0x16a   :  { %v1517_v4 = vpop.f32.mrf.mxu1 }
 0x16b   :  { %886 = vrot.lane.b32.xlu0 %v1516_v1, %s1644_s2 }
 0x16c   :  { %v1518_v5 = vpop.f32.mrf.mxu1 }
 0x16d   :  { %v1519_v6 = vadd.f32 %v1518_v5, %v1517_v4  ;;  %v1952_v4 = vpop.f32.mrf.mxu0  ;;  %v1128_v5 = vld [vmem:[#allocation6 + $0x10] sm:$0xff] }
 0x16e   :  { %v1520_v9 = vpop.f32.mrf.mxu1 }
 0x16f   :  { %888 = vrot.lane.b32.xlu1 %v1519_v6, %s1644_s2 }
 0x170   :  { %v1521_v10 = vpop.f32.mrf.mxu1 }
 0x171   :  { %v1522_v12 = vadd.f32 %v1521_v10, %v1520_v9 }
 0x172   :  { %v1523_v14 = vpop.f32.mrf.mxu1 }
 0x173   :  { %890 = vrot.lane.b32.xlu0 %v1522_v12, %s1644_s2 }
 0x174   :  { %v1524_v19 = vpop.f32.mrf.mxu1 }
 0x175   :  { %v1525_v24 = vadd.f32 %v1524_v19, %v1523_v14  ;;  %v835_v25 = vpop.permute.xlu0 %834  ;;  %v1129_v19 = vld [vmem:[#allocation6 + $0x18] sm:$0xff] }
 0x176   :  { %v931_v32 = vsel %vm930_vm0, %v1326_v17, %v835_v25  ;;  %v1526_v34 = vpop.f32.mrf.mxu1  ;;  %v1961_v17 = vpop.f32.mrf.mxu0 }
 0x177   :  { %v1094_v37 = vmul.f32 %v1062_v20, %v931_v32  ;;  %892 = vrot.lane.b32.xlu1 %v1525_v24, %s1644_s2 }
 0x178   :  { %v1527_v16 = vpop.f32.mrf.mxu1 }
 0x179   :  { %v1158_v40 = vadd.f32 %v1126_v30, %v1094_v37  ;;  %v1528_v44 = vadd.f32 %v1527_v16, %v1526_v34  ;;  %v837_v45 = vpop.permute.xlu0 %836  ;;  %v1338_v30 = vadd.f32 %v1861_v38, %v1858_v36  ;;  %v1969_v34 = vpop.f32.mrf.mxu0  ;;  %v1130_v37 = vld [vmem:[#allocation6 + $0x20] sm:$0xff]  ;;  %v1067_v36 = vld [vmem:[%s2163_s4 + $0x28] sm:$0xff] }
 0x17a   :  { %v932_v52 = vsel %vm930_vm0, %v1329_v39, %v837_v45  ;;  %v1529_v54 = vpop.f32.mrf.mxu1 }
 0x17b   :  { %v1190_v57 = vmax.f32 %v1158_v40, 0.0  ;;  %v1095_v58 = vmul.f32 %v1063_v18, %v932_v52  ;;  %894 = vrot.lane.b32.xlu0 %v1528_v44, %s1644_s2  ;;  %v1341_v40 = vadd.f32 %v1866_v43, %v1863_v41  ;;  %v1977_v45 = vpop.f32.mrf.mxu0  ;;  %v1068_v41 = vld [vmem:[%s2163_s4 + $0x30] sm:$0xff] }
 0x17c   :  { %v1530_v23 = vpop.f32.mrf.mxu1 }
 0x17d   :  { %1222 = vst [vmem:[#allocation8] sm:$0xff] %v1190_v57  ;;  %v1159_v62 = vadd.f32 %v1127_v50, %v1095_v58  ;;  %v1531_v0 = vadd.f32 %v1530_v23, %v1529_v54  ;;  %v839_v1 = vpop.permute.xlu1 %838  ;;  %v1131_v50 = vld [vmem:[#allocation6 + $0x28] sm:$0xff]  ;;  %v1344_v58 = vadd.f32 %v1871_v48, %v1868_v46  ;;  %v1985_v23 = vpop.f32.mrf.mxu0  ;;  %v1069_v46 = vld [vmem:[%s2163_s4 + $0x38] sm:$0xff] }
 0x17e   :  { %v933_v6 = vsel %vm930_vm0, %v1332_v21, %v839_v1 }
 0x17f   :  { %v1191_v9 = vmax.f32 %v1159_v62, 0.0  ;;  %v1096_v10 = vmul.f32 %v1064_v60, %v933_v6  ;;  %896 = vrot.lane.b32.xlu1 %v1531_v0, %s1644_s2  ;;  %v1132_v60 = vld [vmem:[#allocation6 + $0x30] sm:$0xff] }
 0x181   :  { %1223 = vst [vmem:[#allocation8 + $0x8] sm:$0xff] %v1191_v9  ;;  %v1160_v12 = vadd.f32 %v1128_v5, %v1096_v10  ;;  %v841_v14 = vpop.permute.xlu1 %840  ;;  %v1347_v5 = vadd.f32 %v1876_v53, %v1873_v51  ;;  %v1993_v9 = vpop.f32.mrf.mxu0  ;;  %v1133_v10 = vld [vmem:[#allocation6 + $0x38] sm:$0xff]  ;;  %v1070_v51 = vld [vmem:[%s2163_s4 + $0x40] sm:$0xff] }
 0x182   :  { %v934_v20 = vsel %vm930_vm0, %v1335_v26, %v841_v14  ;;  %v1350_v14 = vadd.f32 %v1881_v59, %v1878_v56  ;;  %v1071_v56 = vld [vmem:[%s2163_s4 + $0x48] sm:$0xff] }
 0x183   :  { %v1192_v24 = vmax.f32 %v1160_v12, 0.0  ;;  %v1097_v25 = vmul.f32 %v1065_v28, %v934_v20  ;;  %v2001_v20 = vpop.f32.mrf.mxu0 }
 0x185   :  { %1224 = vst [vmem:[#allocation8 + $0x10] sm:$0xff] %v1192_v24  ;;  %v1161_v33 = vadd.f32 %v1129_v19, %v1097_v25  ;;  %v843_v32 = vpop.permute.xlu0 %842  ;;  %v1134_v24 = vld [vmem:[#allocation6 + $0x40] sm:$0xff] }
 0x186   :  { %v935_v39 = vsel %vm930_vm0, %v1338_v30, %v843_v32 }
 0x187   :  { %v1193_v16 = vmax.f32 %v1161_v33, 0.0  ;;  %v1098_v18 = vmul.f32 %v1066_v31, %v935_v39  ;;  %v1353_v33 = vadd.f32 %v1887_v3, %v1884_v63  ;;  %v1135_v39 = vld [vmem:[#allocation6 + $0x48] sm:$0xff]  ;;  %v1072_v63 = vld [vmem:[%s2163_s4 + $0x50] sm:$0xff] }
 0x189   :  { %1225 = vst [vmem:[#allocation8 + $0x18] sm:$0xff] %v1193_v16  ;;  %v1162_v38 = vadd.f32 %v1130_v37, %v1098_v18  ;;  %v845_v44 = vpop.permute.xlu1 %844  ;;  %v2009_v37 = vpop.f32.mrf.mxu0 }
 0x18a   :  { %v936_v52 = vsel %vm930_vm0, %v1341_v40, %v845_v44 }
 0x18b   :  { %v1194_v54 = vmax.f32 %v1162_v38, 0.0  ;;  %v1099_v57 = vmul.f32 %v1067_v36, %v936_v52  ;;  %v1356_v36 = vadd.f32 %v1893_v11, %v1890_v7  ;;  %v2017_v44 = vpop.f32.mrf.mxu0  ;;  %v1073_v7 = vld [vmem:[%s2163_s4 + $0x58] sm:$0xff] }
 0x18d   :  { %1226 = vst [vmem:[#allocation8 + $0x20] sm:$0xff] %v1194_v54  ;;  %v1163_v43 = vadd.f32 %v1131_v50, %v1099_v57  ;;  %v847_v21 = vpop.permute.xlu0 %846  ;;  %v1136_v50 = vld [vmem:[#allocation6 + $0x50] sm:$0xff] }
 0x18e   :  { %v937_v62 = vsel %vm930_vm0, %v1344_v58, %v847_v21  ;;  %v1359_v58 = vadd.f32 %v1899_v22, %v1896_v15  ;;  %v1137_v21 = vld [vmem:[#allocation6 + $0x58] sm:$0xff]  ;;  %v1074_v15 = vld [vmem:[%s2163_s4 + $0x60] sm:$0xff] }
 0x18f   :  { %v1195_v0 = vmax.f32 %v1163_v43, 0.0  ;;  %v1100_v1 = vmul.f32 %v1068_v41, %v937_v62  ;;  %v2025_v43 = vpop.f32.mrf.mxu0 }
 0x191   :  { %1227 = vst [vmem:[#allocation8 + $0x28] sm:$0xff] %v1195_v0  ;;  %v1164_v48 = vadd.f32 %v1132_v60, %v1100_v1  ;;  %v849_v6 = vpop.permute.xlu1 %848  ;;  %v1362_v1 = vadd.f32 %v1905_v35, %v1902_v29  ;;  %v1075_v29 = vld [vmem:[%s2163_s4 + $0x68] sm:$0xff] }
 0x192   :  { %v938_v26 = vsel %vm930_vm0, %v1347_v5, %v849_v6 }
 0x193   :  { %v1196_v28 = vmax.f32 %v1164_v48, 0.0  ;;  %v1101_v12 = vmul.f32 %v1069_v46, %v938_v26  ;;  %v2033_v46 = vpop.f32.mrf.mxu0  ;;  %v1138_v48 = vld [vmem:[#allocation6 + $0x60] sm:$0xff] }
 0x195   :  { %1228 = vst [vmem:[#allocation8 + $0x30] sm:$0xff] %v1196_v28  ;;  %v1165_v53 = vadd.f32 %v1133_v10, %v1101_v12  ;;  %v851_v19 = vpop.permute.xlu0 %850  ;;  %v1365_v28 = vadd.f32 %v1911_v49, %v1908_v42  ;;  %v1076_v42 = vld [vmem:[%s2163_s4 + $0x70] sm:$0xff] }
 0x196   :  { %v939_v25 = vsel %vm930_vm0, %v1350_v14, %v851_v19  ;;  %v2041_v14 = vpop.f32.mrf.mxu0 }
 0x197   :  { %v1197_v30 = vmax.f32 %v1165_v53, 0.0  ;;  %v1102_v31 = vmul.f32 %v1070_v51, %v939_v25  ;;  %v1139_v51 = vld [vmem:[#allocation6 + $0x68] sm:$0xff]  ;;  %v1368_v25 = vadd.f32 %v1917_v61, %v1914_v55  ;;  %v1077_v55 = vld [vmem:[%s2163_s4 + $0x78] sm:$0xff] }
 0x199   :  { %1229 = vst [vmem:[#allocation8 + $0x38] sm:$0xff] %v1197_v30  ;;  %v1166_v59 = vadd.f32 %v1134_v24, %v1102_v31  ;;  %v853_v32 = vpop.permute.xlu1 %852  ;;  %v2049_v31 = vpop.f32.mrf.mxu0 }
 0x19a   :  { %v940_v16 = vsel %vm930_vm0, %v1353_v33, %v853_v32  ;;  %v1140_v33 = vld [vmem:[#allocation6 + $0x70] sm:$0xff] }
 0x19b   :  { %v1198_v18 = vmax.f32 %v1166_v59, 0.0  ;;  %v1103_v40 = vmul.f32 %v1071_v56, %v940_v16 }
 0x19d   :  { %1230 = vst [vmem:[#allocation8 + $0x40] sm:$0xff] %v1198_v18  ;;  %v1167_v3 = vadd.f32 %v1135_v39, %v1103_v40  ;;  %v855_v38 = vpop.permute.xlu0 %854  ;;  %v1371_v39 = vadd.f32 %v1923_v8, %v1920_v2  ;;  %v2057_v18 = vpop.f32.mrf.mxu0  ;;  %v1141_v40 = vld [vmem:[#allocation6 + $0x78] sm:$0xff]  ;;  %v1078_v2 = vld [vmem:[%s2163_s4 + $0x80] sm:$0xff] }
 0x19e   :  { %v941_v52 = vsel %vm930_vm0, %v1356_v36, %v855_v38  ;;  %v1374_v38 = vadd.f32 %v1934_v27, %v1926_v13  ;;  %v1079_v13 = vld [vmem:[%s2163_s4 + $0x88] sm:$0xff] }
 0x19f   :  { %v1199_v54 = vmax.f32 %v1167_v3, 0.0  ;;  %v1104_v57 = vmul.f32 %v1072_v63, %v941_v52  ;;  %v2065_v52 = vpop.f32.mrf.mxu0 }
 0x1a1   :  { %1231 = vst [vmem:[#allocation8 + $0x48] sm:$0xff] %v1199_v54  ;;  %v1168_v11 = vadd.f32 %v1136_v50, %v1104_v57  ;;  %v857_v41 = vpop.permute.xlu1 %856  ;;  %v1142_v54 = vld [vmem:[#allocation6 + $0x80] sm:$0xff] }
 0x1a2   :  { %v942_v60 = vsel %vm930_vm0, %v1359_v58, %v857_v41 }
 0x1a3   :  { %v1200_v62 = vmax.f32 %v1168_v11, 0.0  ;;  %v1105_v0 = vmul.f32 %v1073_v7, %v942_v60  ;;  %v1377_v11 = vadd.f32 %v1952_v4, %v1943_v47  ;;  %v1143_v60 = vld [vmem:[#allocation6 + $0x88] sm:$0xff]  ;;  %v1080_v47 = vld [vmem:[%s2163_s4 + $0x90] sm:$0xff] }
 0x1a5   :  { %1232 = vst [vmem:[#allocation8 + $0x50] sm:$0xff] %v1200_v62  ;;  %v1169_v22 = vadd.f32 %v1137_v21, %v1105_v0  ;;  %v859_v5 = vpop.permute.xlu0 %858  ;;  %v2073_v21 = vpop.f32.mrf.mxu0 }
 0x1a6   :  { %v943_v6 = vsel %vm930_vm0, %v1362_v1, %v859_v5 }
 0x1a7   :  { %v1201_v10 = vmax.f32 %v1169_v22, 0.0  ;;  %v1106_v26 = vmul.f32 %v1074_v15, %v943_v6  ;;  %v1380_v15 = vadd.f32 %v1969_v34, %v1961_v17  ;;  %v2081_v5 = vpop.f32.mrf.mxu0  ;;  %v1081_v17 = vld [vmem:[%s2163_s4 + $0x98] sm:$0xff] }
 0x1a9   :  { %1233 = vst [vmem:[#allocation8 + $0x58] sm:$0xff] %v1201_v10  ;;  %v1170_v35 = vadd.f32 %v1138_v48, %v1106_v26  ;;  %v861_v12 = vpop.permute.xlu1 %860  ;;  %v1144_v48 = vld [vmem:[#allocation6 + $0x90] sm:$0xff] }
 0x1aa   :  { %v944_v53 = vsel %vm930_vm0, %v1365_v28, %v861_v12  ;;  %v1383_v28 = vadd.f32 %v1985_v23, %v1977_v45  ;;  %v1145_v12 = vld [vmem:[#allocation6 + $0x98] sm:$0xff]  ;;  %v1082_v45 = vld [vmem:[%s2163_s4 + $0xa0] sm:$0xff] }
 0x1ab   :  { %v1202_v19 = vmax.f32 %v1170_v35, 0.0  ;;  %v1107_v24 = vmul.f32 %v1075_v29, %v944_v53  ;;  %v2089_v35 = vpop.f32.mrf.mxu0 }
 0x1ad   :  { %1234 = vst [vmem:[#allocation8 + $0x60] sm:$0xff] %v1202_v19  ;;  %v1171_v49 = vadd.f32 %v1139_v51, %v1107_v24  ;;  %v863_v30 = vpop.permute.xlu0 %862  ;;  %v1386_v24 = vadd.f32 %v2001_v20, %v1993_v9  ;;  %v1083_v9 = vld [vmem:[%s2163_s4 + $0xa8] sm:$0xff] }
 0x1ae   :  { %v945_v56 = vsel %vm930_vm0, %v1368_v25, %v863_v30 }
 0x1af   :  { %v1203_v59 = vmax.f32 %v1171_v49, 0.0  ;;  %v1108_v32 = vmul.f32 %v1076_v42, %v945_v56  ;;  %v1403_v42 = vpop.f32.mrf.mxu0  ;;  %v1146_v49 = vld [vmem:[#allocation6 + $0xa0] sm:$0xff] }
 0x1b1   :  { %1235 = vst [vmem:[#allocation8 + $0x68] sm:$0xff] %v1203_v59  ;;  %v1172_v61 = vadd.f32 %v1140_v33, %v1108_v32  ;;  %v865_v16 = vpop.permute.xlu1 %864  ;;  %v1389_v59 = vadd.f32 %v2017_v44, %v2009_v37  ;;  %v1084_v37 = vld [vmem:[%s2163_s4 + $0xb0] sm:$0xff] }
 0x1b2   :  { %v946_v36 = vsel %vm930_vm0, %v1371_v39, %v865_v16  ;;  %v1405_v39 = vpop.f32.mrf.mxu0 }
 0x1b3   :  { %v1204_v63 = vmax.f32 %v1172_v61, 0.0  ;;  %v1109_v3 = vmul.f32 %v1077_v55, %v946_v36  ;;  %v1147_v55 = vld [vmem:[#allocation6 + $0xa8] sm:$0xff]  ;;  %v1392_v36 = vadd.f32 %v2033_v46, %v2025_v43  ;;  %v1085_v43 = vld [vmem:[%s2163_s4 + $0xb8] sm:$0xff] }
 0x1b5   :  { %1236 = vst [vmem:[#allocation8 + $0x70] sm:$0xff] %v1204_v63  ;;  %v1173_v8 = vadd.f32 %v1141_v40, %v1109_v3  ;;  %v867_v50 = vpop.permute.xlu0 %866  ;;  %v1406_v3 = vpop.f32.mrf.mxu0 }
 0x1b6   :  { %v947_v57 = vsel %vm930_vm0, %v1374_v38, %v867_v50  ;;  %v1148_v38 = vld [vmem:[#allocation6 + $0xb0] sm:$0xff] }
 0x1b7   :  { %v1205_v58 = vmax.f32 %v1173_v8, 0.0  ;;  %v1110_v7 = vmul.f32 %v1078_v2, %v947_v57 }
 0x1b9   :  { %1237 = vst [vmem:[#allocation8 + $0x78] sm:$0xff] %v1205_v58  ;;  %v1174_v27 = vadd.f32 %v1142_v54, %v1110_v7  ;;  %v869_v41 = vpop.permute.xlu1 %868  ;;  %v1395_v54 = vadd.f32 %v2049_v31, %v2041_v14  ;;  %v1408_v58 = vpop.f32.mrf.mxu0  ;;  %v1149_v7 = vld [vmem:[#allocation6 + $0xb8] sm:$0xff]  ;;  %v1086_v14 = vld [vmem:[%s2163_s4 + $0xc0] sm:$0xff] }
 0x1ba   :  { %v948_v62 = vsel %vm930_vm0, %v1377_v11, %v869_v41  ;;  %v1398_v41 = vadd.f32 %v2065_v52, %v2057_v18  ;;  %v1087_v18 = vld [vmem:[%s2163_s4 + $0xc8] sm:$0xff] }
 0x1bb   :  { %v1206_v0 = vmax.f32 %v1174_v27, 0.0  ;;  %v1111_v1 = vmul.f32 %v1079_v13, %v948_v62  ;;  %v1409_v62 = vpop.f32.mrf.mxu0 }
 0x1bd   :  { %1238 = vst [vmem:[#allocation8 + $0x80] sm:$0xff] %v1206_v0  ;;  %v1175_v4 = vadd.f32 %v1143_v60, %v1111_v1  ;;  %v871_v22 = vpop.permute.xlu0 %870  ;;  %v1150_v0 = vld [vmem:[#allocation6 + $0xc0] sm:$0xff] }
 0x1be   :  { %v949_v6 = vsel %vm930_vm0, %v1380_v15, %v871_v22 }
 0x1bf   :  { %v1207_v10 = vmax.f32 %v1175_v4, 0.0  ;;  %v1112_v26 = vmul.f32 %v1080_v47, %v949_v6  ;;  %v1401_v4 = vadd.f32 %v2081_v5, %v2073_v21  ;;  %v1151_v6 = vld [vmem:[#allocation6 + $0xc8] sm:$0xff] }
 0x1c1   :  { %1239 = vst [vmem:[#allocation8 + $0x88] sm:$0xff] %v1207_v10  ;;  %v1176_v34 = vadd.f32 %v1144_v48, %v1112_v26  ;;  %v873_v29 = vpop.permute.xlu1 %872  ;;  %v1411_v48 = vpop.f32.mrf.mxu0 }
 0x1c2   :  { %v950_v51 = vsel %vm930_vm0, %v1383_v28, %v873_v29 }
 0x1c3   :  { %v1208_v53 = vmax.f32 %v1176_v34, 0.0  ;;  %v1113_v19 = vmul.f32 %v1081_v17, %v950_v51  ;;  %v1404_v17 = vadd.f32 %v1403_v42, %v2089_v35  ;;  %v1088_v34 = vld [vmem:[%s2163_s4 + $0xd0] sm:$0xff]  ;;  %v1412_v29 = vpop.f32.mrf.mxu0  ;;  %v1153_v42 = vld [vmem:[#allocation6 + $0xd8] sm:$0xff] }
 0x1c5   :  { %1240 = vst [vmem:[#allocation8 + $0x90] sm:$0xff] %v1208_v53  ;;  %v1177_v23 = vadd.f32 %v1145_v12, %v1113_v19  ;;  %v875_v25 = vpop.permute.xlu0 %874  ;;  %v1152_v12 = vld [vmem:[#allocation6 + $0xd0] sm:$0xff] }
 0x1c6   :  { %v951_v30 = vsel %vm930_vm0, %v1386_v24, %v875_v25  ;;  %v1407_v24 = vadd.f32 %v1406_v3, %v1405_v39  ;;  %v1414_v25 = vpop.f32.mrf.mxu0  ;;  %v1154_v39 = vld [vmem:[#allocation6 + $0xe0] sm:$0xff]  ;;  %v1155_v3 = vld [vmem:[#allocation6 + $0xe8] sm:$0xff] }
 0x1c7   :  { %v1209_v33 = vmax.f32 %v1177_v23, 0.0  ;;  %v1114_v56 = vmul.f32 %v1082_v45, %v951_v30  ;;  %v1089_v45 = vld [vmem:[%s2163_s4 + $0xd8] sm:$0xff] }
 0x1c9   :  { %1241 = vst [vmem:[#allocation8 + $0x98] sm:$0xff] %v1209_v33  ;;  %v1178_v20 = vadd.f32 %v1146_v49, %v1114_v56  ;;  %v877_v32 = vpop.permute.xlu1 %876  ;;  %v1410_v56 = vadd.f32 %v1409_v62, %v1408_v58  ;;  %v1156_v58 = vld [vmem:[#allocation6 + $0xf0] sm:$0xff] }
 0x1ca   :  { %v952_v61 = vsel %vm930_vm0, %v1389_v59, %v877_v32  ;;  %v1090_v59 = vld [vmem:[%s2163_s4 + $0xe0] sm:$0xff]  ;;  %v1415_v32 = vpop.f32.mrf.mxu0 }
 0x1cb   :  { %v1210_v16 = vmax.f32 %v1178_v20, 0.0  ;;  %v1115_v40 = vmul.f32 %v1083_v9, %v952_v61 }
 0x1cd   :  { %1242 = vst [vmem:[#allocation8 + $0xa0] sm:$0xff] %v1210_v16  ;;  %v1179_v44 = vadd.f32 %v1147_v55, %v1115_v40  ;;  %v879_v63 = vpop.permute.xlu0 %878  ;;  %v1413_v40 = vadd.f32 %v1412_v29, %v1411_v48 }
 0x1ce   :  { %v953_v2 = vsel %vm930_vm0, %v1392_v36, %v879_v63  ;;  %v1091_v36 = vld [vmem:[%s2163_s4 + $0xe8] sm:$0xff] }
 0x1cf   :  { %v1211_v8 = vmax.f32 %v1179_v44, 0.0  ;;  %v1116_v50 = vmul.f32 %v1084_v37, %v953_v2  ;;  %v1417_v44 = vpop.f32.mrf.mxu0 }
 0x1d1   :  { %1243 = vst [vmem:[#allocation8 + $0xa8] sm:$0xff] %v1211_v8  ;;  %v1180_v46 = vadd.f32 %v1148_v38, %v1116_v50  ;;  %v881_v57 = vpop.permute.xlu1 %880  ;;  %v1416_v50 = vadd.f32 %v1415_v32, %v1414_v25 }
 0x1d2   :  { %v954_v11 = vsel %vm930_vm0, %v1395_v54, %v881_v57  ;;  %v1092_v54 = vld [vmem:[%s2163_s4 + $0xf0] sm:$0xff] }
 0x1d3   :  { %v1212_v13 = vmax.f32 %v1180_v46, 0.0  ;;  %v1117_v27 = vmul.f32 %v1085_v43, %v954_v11  ;;  %v1418_v46 = vpop.f32.mrf.mxu0 }
 0x1d5   :  { %1244 = vst [vmem:[#allocation8 + $0xb0] sm:$0xff] %v1212_v13  ;;  %v1181_v31 = vadd.f32 %v1149_v7, %v1117_v27  ;;  %v883_v60 = vpop.permute.xlu0 %882  ;;  %v1419_v27 = vadd.f32 %v1418_v46, %v1417_v44 }
 0x1d6   :  { %v955_v1 = vsel %vm930_vm0, %v1398_v41, %v883_v60  ;;  %v1093_v41 = vld [vmem:[%s2163_s4 + $0xf8] sm:$0xff] }
 0x1d7   :  { %v1213_v15 = vmax.f32 %v1181_v31, 0.0  ;;  %v1118_v47 = vmul.f32 %v1086_v14, %v955_v1  ;;  %v1157_v60 = vld [vmem:[#allocation6 + $0xf8] sm:$0xff] }
 0x1d9   :  { %1245 = vst [vmem:[#allocation8 + $0xb8] sm:$0xff] %v1213_v15  ;;  %v1182_v52 = vadd.f32 %v1150_v0, %v1118_v47  ;;  %v885_v22 = vpop.permute.xlu1 %884 }
 0x1da   :  { %v956_v10 = vsel %vm930_vm0, %v1401_v4, %v885_v22 }
 0x1db   :  { %v1214_v26 = vmax.f32 %v1182_v52, 0.0  ;;  %v1119_v28 = vmul.f32 %v1087_v18, %v956_v10 }
 0x1dd   :  { %1246 = vst [vmem:[#allocation8 + $0xc0] sm:$0xff] %v1214_v26  ;;  %v1183_v21 = vadd.f32 %v1151_v6, %v1119_v28  ;;  %v887_v5 = vpop.permute.xlu0 %886 }
 0x1de   :  { %v957_v51 = vsel %vm930_vm0, %v1404_v17, %v887_v5 }
 0x1df   :  { %v1215_v53 = vmax.f32 %v1183_v21, 0.0  ;;  %v1120_v19 = vmul.f32 %v1088_v34, %v957_v51 }
 0x1e1   :  { %1247 = vst [vmem:[#allocation8 + $0xc8] sm:$0xff] %v1215_v53  ;;  %v1184_v35 = vadd.f32 %v1152_v12, %v1120_v19  ;;  %v889_v23 = vpop.permute.xlu1 %888 }
 0x1e2   :  { %v958_v49 = vsel %vm930_vm0, %v1407_v24, %v889_v23 }
 0x1e3   :  { %v1216_v30 = vmax.f32 %v1184_v35, 0.0  ;;  %v1121_v33 = vmul.f32 %v1089_v45, %v958_v49 }
 0x1e5   :  { %1248 = vst [vmem:[#allocation8 + $0xd0] sm:$0xff] %v1216_v30  ;;  %v1185_v9 = vadd.f32 %v1153_v42, %v1121_v33  ;;  %v891_v20 = vpop.permute.xlu0 %890 }
 0x1e6   :  { %v959_v55 = vsel %vm930_vm0, %v1410_v56, %v891_v20 }
 0x1e7   :  { %v1217_v61 = vmax.f32 %v1185_v9, 0.0  ;;  %v1122_v16 = vmul.f32 %v1090_v59, %v959_v55 }
 0x1e9   :  { %1249 = vst [vmem:[#allocation8 + $0xd8] sm:$0xff] %v1217_v61  ;;  %v1186_v37 = vadd.f32 %v1154_v39, %v1122_v16  ;;  %v893_v63 = vpop.permute.xlu1 %892 }
 0x1ea   :  { %v960_v38 = vsel %vm930_vm0, %v1413_v40, %v893_v63 }
 0x1eb   :  { %v1218_v2 = vmax.f32 %v1186_v37, 0.0  ;;  %v1123_v8 = vmul.f32 %v1091_v36, %v960_v38 }
 0x1ed   :  { %1250 = vst [vmem:[#allocation8 + $0xe0] sm:$0xff] %v1218_v2  ;;  %v1187_v43 = vadd.f32 %v1155_v3, %v1123_v8  ;;  %v895_v57 = vpop.permute.xlu0 %894 }
 0x1ee   :  { %v961_v7 = vsel %vm930_vm0, %v1416_v50, %v895_v57 }
 0x1ef   :  { %v1219_v11 = vmax.f32 %v1187_v43, 0.0  ;;  %v1124_v13 = vmul.f32 %v1092_v54, %v961_v7 }
 0x1f1   :  { %1251 = vst [vmem:[#allocation8 + $0xe8] sm:$0xff] %v1219_v11  ;;  %v1188_v14 = vadd.f32 %v1156_v58, %v1124_v13  ;;  %v897_v31 = vpop.permute.xlu1 %896 }
 0x1f2   :  { %v962_v62 = vsel %vm930_vm0, %v1419_v27, %v897_v31 }
 0x1f3   :  { %v1220_v0 = vmax.f32 %v1188_v14, 0.0  ;;  %v1125_v1 = vmul.f32 %v1093_v41, %v962_v62 }
 0x1f5   :  { %1252 = vst [vmem:[#allocation8 + $0xf0] sm:$0xff] %v1220_v0  ;;  %v1189_v15 = vadd.f32 %v1157_v60, %v1125_v1 }
 0x1f7   :  { %v1221_v47 = vmax.f32 %v1189_v15, 0.0 }
 0x1f9   :  { %1253 = vst [vmem:[#allocation8 + $0xf8] sm:$0xff] %v1221_v47 }
 0x1fa   :  { %1623 = shalt.err (!%p1620_p0)
}
 0x1fb   :  { %1265 = dma.vmem_to_hbm [thread:$0]  %s1260_s16, 4096, %s2165_s6, [#allocation5], %s1642_s7, %s1642_s7, %s1643_s8  }
 0x1fc   :  { %1636 = dma.done.wait [#allocation5], 4096  }
 0x1fd   :  { %1637 = vsyncadd [#allocation5], 4294963200 }
 0x1fe   :  { %1269 = vsyncpa [#allocation4], 1 }
 0x1ff   :  { %1270 = vsyncpa [#allocation7], 1 }
 0x200   :  { %1271 = vsyncpa [#allocation5], 1 }

</bundles_post_ra>
